<compile_context>
chip_gen: v5e
topology: v5e:2x2
jax: 0.10.0
libtpu: 0.0.40
codegen_flags: <defaults>
</compile_context>

<pallas_src>
import jax
import jax.numpy as jnp
from jax.experimental import pallas as pl
from jax.experimental.pallas import tpu as pltpu


def _round_up(x: int, m: int) -> int:
    return ((x + m - 1) // m) * m


def fc_layer_kernel(x_ref, w_ref, shift_ref, o_ref):
    # Fused: Linear (bias + BN-eval folded into W / shift) -> ReLU
    y = jnp.dot(x_ref[...], w_ref[...], preferred_element_type=jnp.float32)  # MXU
    y = y + shift_ref[...]                      # (1, out_pad) broadcast over rows
    o_ref[...] = jnp.maximum(y, 0.0).astype(o_ref.dtype)   # ReLU, lane-dense store
    # TODO(synk): Dropout(p=0.1) is identity in eval mode; not applied here.


def fc_layer_forward(x, w, b, gamma, beta, running_mean, running_var,
                     eps=1e-3, block_n=512, compute_dtype=jnp.float32):
    """x: (N, in_dim) f32, w: (in_dim, out_dim) f32 (pre-transposed Linear weight)."""
    N, in_dim = x.shape
    out_dim = w.shape[1]

    # ---- trace-time folding (plain JAX glue, all in f32) --------------------
    scale = gamma / jnp.sqrt(running_var + eps)             # BN eval scale
    w_fold = w * scale[None, :]                             # W' = W * scale
    shift = (b - running_mean) * scale + beta               # folded bias + BN shift

    # ---- lane-dense output padding ------------------------------------------
    out_pad = _round_up(out_dim, 128)
    if out_pad != out_dim:
        w_fold = jnp.pad(w_fold, ((0, 0), (0, out_pad - out_dim)))
        shift = jnp.pad(shift, ((0, out_pad - out_dim),))

    # ---- batch tiling ---------------------------------------------------------
    block_n = max(8, min(block_n, _round_up(N, 8)))
    n_pad = _round_up(N, block_n)
    if n_pad != N:
        x = jnp.pad(x, ((0, n_pad - N), (0, 0)))

    # Optional narrow MXU operands (f32 accumulation, f32 epilogue).
    x = x.astype(compute_dtype)
    w_fold = w_fold.astype(compute_dtype)
    shift = shift.reshape(1, out_pad).astype(jnp.float32)

    # ---- VMEM budget from actual block sizes (double-buffered) ---------------
    in_bytes = jnp.dtype(compute_dtype).itemsize
    vmem_bytes = 2 * (block_n * in_dim * in_bytes      # x tile
                      + in_dim * out_pad * in_bytes    # folded weight
                      + out_pad * 4                    # shift row
                      + block_n * out_pad * 4)         # output tile
    vmem_bytes = int(min(vmem_bytes + (4 << 20), 48 << 20))  # headroom < 64 MiB (v7x)

    grid = (n_pad // block_n,)

    out = pl.pallas_call(
        fc_layer_kernel,
        out_shape=jax.ShapeDtypeStruct((n_pad, out_pad), jnp.float32),
        grid_spec=pltpu.PrefetchScalarGridSpec(
            num_scalar_prefetch=0,
            grid=grid,
            in_specs=[
                pl.BlockSpec((block_n, in_dim), lambda i: (i, 0)),
                pl.BlockSpec((in_dim, out_pad), lambda i: (0, 0)),
                pl.BlockSpec((1, out_pad), lambda i: (0, 0)),
            ],
            out_specs=pl.BlockSpec((block_n, out_pad), lambda i: (i, 0)),
        ),
        compiler_params=pltpu.CompilerParams(
            dimension_semantics=("parallel",),   # shards batch tiles across TCs on v7x
            vmem_limit_bytes=vmem_bytes,
        ),
    )(x, w_fold, shift)

    return out[:N, :out_dim]


if __name__ == "__main__":
    # Small shapes consistent with FCLayer(in_dim=32, out_dim=16), batch=8.
    N, in_dim, out_dim = 8, 32, 16

    key = jax.random.PRNGKey(0)
    kx, kw, kb, kg, kbeta, km, kv = jax.random.split(key, 7)

    x = jax.random.normal(kx, (N, in_dim), dtype=jnp.float32)

    # Deterministic synthetic parameters (shapes from nn.Linear / nn.BatchNorm1d).
    w = jax.random.normal(kw, (in_dim, out_dim), dtype=jnp.float32) * 0.1  # Linear.weight.T
    b = jax.random.normal(kb, (out_dim,), dtype=jnp.float32) * 0.1         # Linear.bias
    gamma = 1.0 + 0.1 * jax.random.normal(kg, (out_dim,), dtype=jnp.float32)
    beta = 0.1 * jax.random.normal(kbeta, (out_dim,), dtype=jnp.float32)
    running_mean = 0.1 * jax.random.normal(km, (out_dim,), dtype=jnp.float32)
    running_var = 1.0 + 0.1 * jax.random.uniform(kv, (out_dim,), dtype=jnp.float32)

    out = fc_layer_forward(x, w, b, gamma, beta, running_mean, running_var, eps=1e-3)
    out = jax.block_until_ready(out)

    # Pure-JAX reference check of the fused kernel.
    ref = jnp.maximum(
        ((x @ w + b) - running_mean) / jnp.sqrt(running_var + 1e-3) * gamma + beta,
        0.0,
    )
    assert out.shape == (N, out_dim)
    assert jnp.allclose(out, ref, atol=1e-5, rtol=1e-5)

    print("KERNEL_OK")
</pallas_src>

<mosaic_0001>
module attributes {stable_mosaic.version = 11 : i64} {
  func.func @fc_layer_kernel(%arg0: i32, %arg1: memref<8x32xf32, #tpu.memory_space<vmem>>, %arg2: memref<32x128xf32, #tpu.memory_space<vmem>>, %arg3: memref<1x128xf32, #tpu.memory_space<vmem>>, %arg4: memref<8x128xf32, #tpu.memory_space<vmem>>) attributes {dimension_semantics = [#tpu.dimension_semantics<parallel>], iteration_bounds = array<i64: 1>, scalar_prefetch = 0 : i64, scratch_operands = 0 : i64, tpu.core_type = #tpu.core_type<tc>, window_params = [{transform_indices = @transform_0, window_bounds = array<i64: 8, 32>}, {pipeline_mode = #tpu.pipeline_mode<synchronous>, transform_indices = @transform_1, window_bounds = array<i64: 32, 128>}, {pipeline_mode = #tpu.pipeline_mode<synchronous>, transform_indices = @transform_2, window_bounds = array<i64: 1, 128>}, {transform_indices = @transform_3, window_bounds = array<i64: 8, 128>}]} {
    %c0 = arith.constant 0 : index
    %c0_0 = arith.constant 0 : index
    %0 = vector.load %arg1[%c0, %c0_0] : memref<8x32xf32, #tpu.memory_space<vmem>>, vector<8x32xf32>
    %c0_1 = arith.constant 0 : index
    %c0_2 = arith.constant 0 : index
    %1 = vector.load %arg2[%c0_1, %c0_2] : memref<32x128xf32, #tpu.memory_space<vmem>>, vector<32x128xf32>
    %cst = arith.constant dense<0.000000e+00> : vector<8x128xf32>
    %2 = tpu.matmul %0, %1, %cst {dimension_numbers = #tpu.dot_dimension_numbers<[1], [0], [0], [1], [0, 0, 1, 1], [], []>} : vector<8x32xf32>, vector<32x128xf32>, vector<8x128xf32> -> vector<8x128xf32>
    %c0_3 = arith.constant 0 : index
    %c0_4 = arith.constant 0 : index
    %3 = vector.load %arg3[%c0_3, %c0_4] : memref<1x128xf32, #tpu.memory_space<vmem>>, vector<1x128xf32>
    %4 = vector.broadcast %3 : vector<1x128xf32> to vector<8x128xf32>
    %5 = arith.addf %2, %4 : vector<8x128xf32>
    %cst_5 = arith.constant 0.000000e+00 : f32
    %6 = vector.broadcast %cst_5 : f32 to vector<8x128xf32>
    %7 = arith.maximumf %5, %6 : vector<8x128xf32>
    %c0_6 = arith.constant 0 : index
    %c0_7 = arith.constant 0 : index
    %8 = vector.load %arg4[%c0_6, %c0_7] : memref<8x128xf32, #tpu.memory_space<vmem>>, vector<8x128xf32>
    tpu.vector_store %arg4[%c0_6, %c0_7], %7 {strides = array<i32>} : memref<8x128xf32, #tpu.memory_space<vmem>>, vector<8x128xf32>,
    return
  }
  func.func @transform_0(%arg0: i32) -> (i32, i32) {
    %c0_i32 = arith.constant 0 : i32
    %c0_i32_0 = arith.constant 0 : i32
    return %arg0, %c0_i32 : i32, i32
  }
  func.func @transform_1(%arg0: i32) -> (i32, i32) {
    %c0_i32 = arith.constant 0 : i32
    %c0_i32_0 = arith.constant 0 : i32
    %c0_i32_1 = arith.constant 0 : i32
    return %c0_i32, %c0_i32_0 : i32, i32
  }
  func.func @transform_2(%arg0: i32) -> (i32, i32) {
    %c0_i32 = arith.constant 0 : i32
    %c0_i32_0 = arith.constant 0 : i32
    %c0_i32_1 = arith.constant 0 : i32
    return %c0_i32, %c0_i32_0 : i32, i32
  }
  func.func @transform_3(%arg0: i32) -> (i32, i32) {
    %c0_i32 = arith.constant 0 : i32
    %c0_i32_0 = arith.constant 0 : i32
    return %arg0, %c0_i32 : i32, i32
  }
}

</mosaic_0001>

<bundles_post_ra>
// kernel: tpu_custom_call.1
= control target key start
LH: loop header
LB: loop body
LE: loop exit
PB: predicated region body
PF: predicated region fallthrough
CT: control target
= control target key end

     0   :  { %8 = vsyncpa [#allocation3], 0  ;;  %s220_s0 = inlined_call_operand.hbm [shape: f32[8,32], index: 0, kind: input, shape index: {}]   ;;  %s221_s1 = inlined_call_operand.hbm [shape: f32[32,128], index: 1, kind: input, shape index: {}]   ;;  %s222_s2 = inlined_call_operand.vmem [shape: f32[1,128], index: 2, kind: input, shape index: {}]   ;;  %s223_s3 = inlined_call_operand.hbm [shape: f32[8,128], index: 3, kind: output, shape index: {}]  }
   0x1   :  { %9 = vsyncpa [#allocation6], 0 }
   0x2   :  { %10 = vsyncpa [#allocation4], 0  ;;  %s16_s14 = sshll.u32 %s220_s0, 4  ;;  %s183_s15 = smov [#allocation2]   ;;  %s17_s14 = int_to_ptr.hbm [resolvable:$true] %s16_s14 }
   0x3   :  { %s18_s16 = sshll.u32 %s183_s15, 4  ;;  %s26_s19 = sshll.u32 %s221_s1, 4  ;;  %s19_s16 = int_to_ptr.vmem [resolvable:$true] %s18_s16  ;;  %s27_s19 = int_to_ptr.hbm [resolvable:$true] %s26_s19 }
   0x4   :  { %21 = dma.hbm_to_vmem [thread:$0]  %s17_s14, 128, %s19_s16, [#allocation3]  }
   0x5   :  { %s184_s20 = smov [#allocation5]   ;;  %s185_s22 = smov 128  }
   0x6   :  { %s28_s21 = sshll.u32 %s184_s20, 4  ;;  %s186_s23 = smov 8   ;;  %s29_s21 = int_to_ptr.vmem [resolvable:$true] %s28_s21 }
   0x7   :  { %34 = dma.hbm_to_vmem [thread:$0]  %s27_s19, 512, %s29_s21, [#allocation6], %s185_s22, %s185_s22, %s186_s23  }
   0x8   :  { %177 = dma.done.wait [#allocation3], 128  }
   0x9   :  { %178 = vsyncadd [#allocation3], 4294967168 }
   0xa   :  { %179 = dma.done.wait [#allocation6], 512  }
   0xb   :  { %180 = vsyncadd [#allocation6], 4294966784  ;;  %v49_v0 = vld [vmem:[#allocation5 + $0x18] sm:$0xff]  ;;  %v48_v1 = vld [vmem:[#allocation5 + $0x10] sm:$0xff]  ;;  %vm54_vm0 = vcmask 261120   ;;  %s187_s24 = smov [#allocation7]  }
   0xc   :  { %70 = vmatpush.msra.mxu0 %v49_v0  ;;  %v47_v2 = vld [vmem:[#allocation5 + $0x8] sm:$0xff]  ;;  %v46_v3 = vld [vmem:[#allocation5] sm:$0xff]  ;;  %v45_v4 = vld [vmem:[#allocation2] sm:$0xff]  ;;  %s85_s25 = sshll.u32 %s187_s24, 4  ;;  %s87_s28 = sshll.u32 %s223_s3, 4  ;;  %s86_s25 = int_to_ptr.vmem [resolvable:$true] %s85_s25  ;;  %s88_s28 = int_to_ptr.hbm [resolvable:$true] %s87_s28 }
   0xd   :  { %v104_v5 = vld [vmem:[%s222_s2] ss:$0 sm:$0xff] }
   0xe   :  { %71 = vmatpush.msra.mxu0 %v48_v1 }
  0x10   :  { %72 = vmatpush.msra.mxu0 %v47_v2 }
  0x12   :  { %73 = vmatpush.msra.mxu0 %v46_v3 }
  0x13   :  { %98 = vmatmul.msk.f32.vlgmr.msra.gmra.mxu0 %vm54_vm0, %v45_v4 }
  0x90   :  { %v75_v6 = vpop.f32.mrf.mxu0 }
  0x91   :  { %v76_v7 = vadd.f32 %v104_v5, %v75_v6 }
  0x93   :  { %v78_v8 = vmax.f32 %v76_v7, 0.0 }
  0x95   :  { %79 = vst [vmem:[#allocation7] sm:$0xff] %v78_v8 }
  0x96   :  { %90 = dma.vmem_to_hbm [thread:$0]  %s86_s25, 128, %s88_s28, [#allocation4]  }
  0x97   :  { %181 = dma.done.wait [#allocation4], 128  }
  0x98   :  { %182 = vsyncadd [#allocation4], 4294967168 }
  0x99   :  { %95 = vsyncpa [#allocation3], 1 }
  0x9a   :  { %96 = vsyncpa [#allocation6], 1 }
  0x9b   :  { %97 = vsyncpa [#allocation4], 1 }

</bundles_post_ra>
